<compile_context>
chip_gen: v6e
topology: v6e:2x2x1
jax: 0.10.0
libtpu: 0.0.40
codegen_flags: <defaults>
</compile_context>

<pallas_src>
import functools
import math

import jax
import jax.numpy as jnp
from jax import lax
from jax.experimental import pallas as pl
from jax.experimental.pallas import tpu as pltpu

_LANES = 512                      # lane-dense output slab width (multiple of 128)
_MAX_TILE_BYTES = 2 * 1024 * 1024  # per output buffer (double-buffered -> 4 MiB)
_SUBLANES = {4: 8, 2: 16, 1: 32}   # sublane packing per dtype itemsize


def _round_up(a, b):
    return -(-a // b) * b


def _hash32(x):
    """lowbias32 integer mixer (good avalanche on consecutive counters)."""
    x = x ^ lax.shift_right_logical(x, jnp.uint32(16))
    x = x * jnp.uint32(0x7FEB352D)
    x = x ^ lax.shift_right_logical(x, jnp.uint32(15))
    x = x * jnp.uint32(0x846CA68B)
    x = x ^ lax.shift_right_logical(x, jnp.uint32(16))
    return x


def _uniform01(bits):
    """uint32 bits -> f32 uniform in (0, 1); never 0, so log() is safe."""
    return (lax.shift_right_logical(bits, jnp.uint32(8)).astype(jnp.float32)
            + 0.5) * (1.0 / (1 << 24))


def _noise_kernel(mean, std, half, seed_ref, o_ref):
    lanes = o_ref.shape[1]
    shape = (half, lanes)

    # Globally unique per-pair counter: (program_id * half + row) * lanes + lane.
    row = lax.broadcasted_iota(jnp.int32, shape, 0).astype(jnp.uint32)
    lane = lax.broadcasted_iota(jnp.int32, shape, 1).astype(jnp.uint32)
    pid = pl.program_id(0).astype(jnp.uint32)
    base = (pid * jnp.uint32(half) + row) * jnp.uint32(lanes) + lane

    # Two decorrelated streams derived from the user seed (scalar work, hoisted).
    seed = seed_ref[0].astype(jnp.uint32)
    k1 = _hash32(seed ^ jnp.uint32(0x3C6EF372))
    k2 = _hash32(seed ^ jnp.uint32(0x9E3779B9))

    u1 = _uniform01(_hash32(base + k1))
    u2 = _uniform01(_hash32(base + k2))

    # Paired Box-Muller: one (u1, u2) draw -> two independent standard normals.
    r = jnp.sqrt(-2.0 * jnp.log(u1))
    theta = (2.0 * math.pi) * u2
    z1 = r * jnp.cos(theta)
    z2 = r * jnp.sin(theta)

    if mean != 0.0 or std != 1.0:   # trace-time skip for the NASLib default (0, 1)
        z1 = mean + std * z1
        z2 = mean + std * z2

    # Two unmasked, sublane-aligned, lane-dense stores (half is a multiple of
    # the dtype's sublane packing).
    o_ref[0:half, :] = z1.astype(o_ref.dtype)
    o_ref[half:2 * half, :] = z2.astype(o_ref.dtype)


def noise_op(x, *, stride, mean, std, seed=0):
    """Forward of NoiseOp: Gaussian noise shaped like x[:, :, ::stride, ::stride]."""
    B, C, H, W = x.shape
    if stride != 1:
        Ho = -(-H // stride)    # == len(range(0, H, stride))
        Wo = -(-W // stride)
    else:
        Ho, Wo = H, W
    total = B * C * Ho * Wo
    dtype = jnp.dtype(x.dtype)

    sub = _SUBLANES.get(dtype.itemsize, 8)
    pair = 2 * sub                         # tile rows split into two sublane-aligned halves
    rows = -(-total // _LANES)
    rows_aligned = _round_up(rows, pair)

    max_tile = max(pair, (_MAX_TILE_BYTES // (_LANES * dtype.itemsize)) // pair * pair)
    if rows_aligned <= max_tile:
        tile_m = rows_aligned
    else:
        tile_m = max_tile
        # Prefer a tile in [max_tile/2, max_tile] that divides rows_aligned
        # exactly -> no padding, wrapper becomes a pure metadata reshape.
        for t in range(max_tile, max_tile // 2 - 1, -pair):
            if rows_aligned % t == 0:
                tile_m = t
                break
    rows_pad = _round_up(rows_aligned, tile_m)
    grid = rows_pad // tile_m
    # Keep >= 2 grid steps when cheap so the "parallel" axis can shard across
    # both TensorCores on v7x.
    if grid == 1 and tile_m % (2 * pair) == 0:
        tile_m //= 2
        grid = 2
    half = tile_m // 2

    seed_arr = jnp.asarray([seed], dtype=jnp.int32)

    out_flat = pl.pallas_call(
        functools.partial(_noise_kernel, float(mean), float(std), half),
        out_shape=jax.ShapeDtypeStruct((rows_pad, _LANES), x.dtype),
        grid_spec=pltpu.PrefetchScalarGridSpec(
            num_scalar_prefetch=1,         # seed lands in SMEM before the grid runs
            grid=(grid,),
            in_specs=[],                   # x is never read: zero input DMA
            out_specs=pl.BlockSpec((tile_m, _LANES), lambda i, seed_ref: (i, 0)),
        ),
        compiler_params=pltpu.CompilerParams(
            dimension_semantics=("parallel",),   # steps independent -> megacore OK
            vmem_limit_bytes=32 * 1024 * 1024,
        ),
    )(seed_arr)

    out = out_flat.reshape(-1)
    if rows_pad * _LANES != total:     # only for ragged sizes; common case is exact fit
        out = out[:total]
    return out.reshape(B, C, Ho, Wo)


if __name__ == "__main__":
    # Shapes consistent with the module: NCHW input, stride-2 noise op.
    B, C, H, W = 2, 4, 16, 16
    stride, mean, std = 2, 0.0, 1.0

    key = jax.random.PRNGKey(0)
    x = jax.random.normal(key, (B, C, H, W), dtype=jnp.float32)

    out = noise_op(x, stride=stride, mean=mean, std=std, seed=0)
    out = jax.block_until_ready(out)

    assert out.shape == (B, C, H // stride, W // stride), out.shape
    assert bool(jnp.all(jnp.isfinite(out)))
    # Loose distributional sanity check (512 iid samples of N(0, 1)).
    m = float(jnp.mean(out))
    s = float(jnp.std(out))
    assert abs(m - mean) < 0.5 and 0.5 < s < 1.5, (m, s)
    print("KERNEL_OK")
</pallas_src>

<mosaic_0001>
module attributes {stable_mosaic.version = 11 : i64} {
  func.func @_noise_kernel(%arg0: i32, %arg1: memref<1xi32, #tpu.memory_space<smem>>, %arg2: memref<16x512xf32, #tpu.memory_space<vmem>>) attributes {dimension_semantics = [#tpu.dimension_semantics<parallel>], iteration_bounds = array<i64: 1>, scalar_prefetch = 1 : i64, scratch_operands = 0 : i64, tpu.core_type = #tpu.core_type<tc>, window_params = [{transform_indices = @transform_0, window_bounds = array<i64: 16, 512>}]} {
    %0 = tpu.iota {dimensions = array<i32: 0>} : vector<8x512xi32>
    %1 = tpu.iota {dimensions = array<i32: 1>} : vector<8x512xi32>
    %c8_i32 = arith.constant 8 : i32
    %2 = arith.muli %arg0, %c8_i32 : i32
    %3 = vector.broadcast %2 : i32 to vector<8x512xi32>
    %4 = arith.addi %3, %0 : vector<8x512xi32>
    %c512_i32 = arith.constant 512 : i32
    %5 = vector.broadcast %c512_i32 : i32 to vector<8x512xi32>
    %6 = arith.muli %4, %5 : vector<8x512xi32>
    %7 = arith.addi %6, %1 : vector<8x512xi32>
    %c0 = arith.constant 0 : index
    %8 = memref.load %arg1[%c0] : memref<1xi32, #tpu.memory_space<smem>>
    %c1013904242_i32 = arith.constant 1013904242 : i32
    %9 = arith.xori %8, %c1013904242_i32 : i32
    %c16_i32 = arith.constant 16 : i32
    %10 = arith.shrui %9, %c16_i32 : i32
    %11 = arith.xori %9, %10 : i32
    %c2146121005_i32 = arith.constant 2146121005 : i32
    %12 = arith.muli %11, %c2146121005_i32 : i32
    %c15_i32 = arith.constant 15 : i32
    %13 = arith.shrui %12, %c15_i32 : i32
    %14 = arith.xori %12, %13 : i32
    %c-2073254261_i32 = arith.constant -2073254261 : i32
    %15 = arith.muli %14, %c-2073254261_i32 : i32
    %c16_i32_0 = arith.constant 16 : i32
    %16 = arith.shrui %15, %c16_i32_0 : i32
    %17 = arith.xori %15, %16 : i32
    %c-1640531527_i32 = arith.constant -1640531527 : i32
    %18 = arith.xori %8, %c-1640531527_i32 : i32
    %c16_i32_1 = arith.constant 16 : i32
    %19 = arith.shrui %18, %c16_i32_1 : i32
    %20 = arith.xori %18, %19 : i32
    %c2146121005_i32_2 = arith.constant 2146121005 : i32
    %21 = arith.muli %20, %c2146121005_i32_2 : i32
    %c15_i32_3 = arith.constant 15 : i32
    %22 = arith.shrui %21, %c15_i32_3 : i32
    %23 = arith.xori %21, %22 : i32
    %c-2073254261_i32_4 = arith.constant -2073254261 : i32
    %24 = arith.muli %23, %c-2073254261_i32_4 : i32
    %c16_i32_5 = arith.constant 16 : i32
    %25 = arith.shrui %24, %c16_i32_5 : i32
    %26 = arith.xori %24, %25 : i32
    %27 = vector.broadcast %17 : i32 to vector<8x512xi32>
    %28 = arith.addi %7, %27 : vector<8x512xi32>
    %c16_i32_6 = arith.constant 16 : i32
    %29 = vector.broadcast %c16_i32_6 : i32 to vector<8x512xi32>
    %30 = arith.shrui %28, %29 : vector<8x512xi32>
    %31 = arith.xori %28, %30 : vector<8x512xi32>
    %c2146121005_i32_7 = arith.constant 2146121005 : i32
    %32 = vector.broadcast %c2146121005_i32_7 : i32 to vector<8x512xi32>
    %33 = arith.muli %31, %32 : vector<8x512xi32>
    %c15_i32_8 = arith.constant 15 : i32
    %34 = vector.broadcast %c15_i32_8 : i32 to vector<8x512xi32>
    %35 = arith.shrui %33, %34 : vector<8x512xi32>
    %36 = arith.xori %33, %35 : vector<8x512xi32>
    %c-2073254261_i32_9 = arith.constant -2073254261 : i32
    %37 = vector.broadcast %c-2073254261_i32_9 : i32 to vector<8x512xi32>
    %38 = arith.muli %36, %37 : vector<8x512xi32>
    %c16_i32_10 = arith.constant 16 : i32
    %39 = vector.broadcast %c16_i32_10 : i32 to vector<8x512xi32>
    %40 = arith.shrui %38, %39 : vector<8x512xi32>
    %41 = arith.xori %38, %40 : vector<8x512xi32>
    %c8_i32_11 = arith.constant 8 : i32
    %42 = vector.broadcast %c8_i32_11 : i32 to vector<8x512xi32>
    %43 = arith.shrui %41, %42 : vector<8x512xi32>
    %44 = arith.uitofp %43 : vector<8x512xi32> to vector<8x512xf32>
    %cst = arith.constant 5.000000e-01 : f32
    %45 = vector.broadcast %cst : f32 to vector<8x512xf32>
    %46 = arith.addf %44, %45 : vector<8x512xf32>
    %cst_12 = arith.constant 5.96046448E-8 : f32
    %47 = vector.broadcast %cst_12 : f32 to vector<8x512xf32>
    %48 = arith.mulf %46, %47 : vector<8x512xf32>
    %49 = vector.broadcast %26 : i32 to vector<8x512xi32>
    %50 = arith.addi %7, %49 : vector<8x512xi32>
    %c16_i32_13 = arith.constant 16 : i32
    %51 = vector.broadcast %c16_i32_13 : i32 to vector<8x512xi32>
    %52 = arith.shrui %50, %51 : vector<8x512xi32>
    %53 = arith.xori %50, %52 : vector<8x512xi32>
    %c2146121005_i32_14 = arith.constant 2146121005 : i32
    %54 = vector.broadcast %c2146121005_i32_14 : i32 to vector<8x512xi32>
    %55 = arith.muli %53, %54 : vector<8x512xi32>
    %c15_i32_15 = arith.constant 15 : i32
    %56 = vector.broadcast %c15_i32_15 : i32 to vector<8x512xi32>
    %57 = arith.shrui %55, %56 : vector<8x512xi32>
    %58 = arith.xori %55, %57 : vector<8x512xi32>
    %c-2073254261_i32_16 = arith.constant -2073254261 : i32
    %59 = vector.broadcast %c-2073254261_i32_16 : i32 to vector<8x512xi32>
    %60 = arith.muli %58, %59 : vector<8x512xi32>
    %c16_i32_17 = arith.constant 16 : i32
    %61 = vector.broadcast %c16_i32_17 : i32 to vector<8x512xi32>
    %62 = arith.shrui %60, %61 : vector<8x512xi32>
    %63 = arith.xori %60, %62 : vector<8x512xi32>
    %c8_i32_18 = arith.constant 8 : i32
    %64 = vector.broadcast %c8_i32_18 : i32 to vector<8x512xi32>
    %65 = arith.shrui %63, %64 : vector<8x512xi32>
    %66 = arith.uitofp %65 : vector<8x512xi32> to vector<8x512xf32>
    %cst_19 = arith.constant 5.000000e-01 : f32
    %67 = vector.broadcast %cst_19 : f32 to vector<8x512xf32>
    %68 = arith.addf %66, %67 : vector<8x512xf32>
    %cst_20 = arith.constant 5.96046448E-8 : f32
    %69 = vector.broadcast %cst_20 : f32 to vector<8x512xf32>
    %70 = arith.mulf %68, %69 : vector<8x512xf32>
    %71 = math.log %48 : vector<8x512xf32>
    %cst_21 = arith.constant -2.000000e+00 : f32
    %72 = vector.broadcast %cst_21 : f32 to vector<8x512xf32>
    %73 = arith.mulf %72, %71 : vector<8x512xf32>
    %74 = math.sqrt %73 : vector<8x512xf32>
    %cst_22 = arith.constant 6.28318548 : f32
    %75 = vector.broadcast %cst_22 : f32 to vector<8x512xf32>
    %76 = arith.mulf %75, %70 : vector<8x512xf32>
    %77 = math.cos %76 : vector<8x512xf32>
    %78 = arith.mulf %74, %77 : vector<8x512xf32>
    %79 = math.sin %76 : vector<8x512xf32>
    %80 = arith.mulf %74, %79 : vector<8x512xf32>
    %c0_23 = arith.constant 0 : index
    %c0_24 = arith.constant 0 : index
    %81 = vector.load %arg2[%c0_23, %c0_24] : memref<16x512xf32, #tpu.memory_space<vmem>>, vector<8x512xf32>
    tpu.vector_store %arg2[%c0_23, %c0_24], %78 {strides = array<i32>} : memref<16x512xf32, #tpu.memory_space<vmem>>, vector<8x512xf32>,
    %c8 = arith.constant 8 : index
    %c0_25 = arith.constant 0 : index
    %82 = vector.load %arg2[%c8, %c0_25] : memref<16x512xf32, #tpu.memory_space<vmem>>, vector<8x512xf32>
    tpu.vector_store %arg2[%c8, %c0_25], %80 {strides = array<i32>} : memref<16x512xf32, #tpu.memory_space<vmem>>, vector<8x512xf32>,
    return
  }
  func.func @transform_0(%arg0: i32, %arg1: memref<1xi32, #tpu.memory_space<smem>>) -> (i32, i32) {
    %c0_i32 = arith.constant 0 : i32
    %c0_i32_0 = arith.constant 0 : i32
    return %arg0, %c0_i32 : i32, i32
  }
}

</mosaic_0001>

<bundles_post_ra>
// kernel: tpu_custom_call.1
= control target key start
LH: loop header
LB: loop body
LE: loop exit
PB: predicated region body
PF: predicated region fallthrough
CT: control target
= control target key end

     0   :  { %7 = vsyncpa [#allocation5], 0  ;;  %v8_v0 = vlaneseq  ;;  %s1209_s27 = smov [#allocation4]   ;;  %s1632_s0 = inlined_call_operand.<no memory space> [shape: s32[1], index: 0, kind: input, shape index: {}]   ;;  %s1633_s1 = inlined_call_operand.hbm [shape: f32[16,512], index: 1, kind: output, shape index: {}]  }
   0x1   :  { %s24_s8 = sxor.u32 1013904242, %s1632_s0  ;;  %s33_s11 = sxor.u32 2654435769, %s1632_s0 }
   0x2   :  { %s25_s12 = sshrl.u32 %s24_s8, 16  ;;  %s34_s13 = sshrl.u32 %s33_s11, 16  ;;  %v9_v1 = vshrl.u32 %v8_v0, 7  ;;  %v11_v2 = vand.u32 127, %v8_v0 }
   0x3   :  { %s26_s14 = sxor.u32 %s25_s12, %s24_s8  ;;  %s35_s15 = sxor.u32 %s34_s13, %s33_s11 }
   0x4   :  { %s27_s16 = smul.u32 2146121005, %s26_s14  ;;  %v12_v3 = vadd.s32 128, %v11_v2  ;;  %v13_v4 = vadd.s32 256, %v11_v2  ;;  %v14_v5 = vadd.s32 384, %v11_v2  ;;  %v18_v6 = vmul.u32 512, %v9_v1 }
   0x5   :  { %s36_s17 = smul.u32 2146121005, %s35_s15  ;;  %s1081_s28 = sshll.u32 %s1209_s27, 4  ;;  %s1082_s28 = int_to_ptr.vmem [resolvable:$true] %s1081_s28 }
   0x6   :  { %s28_s18 = sshrl.u32 %s27_s16, 15  ;;  %v19_v7 = vadd.s32 %v18_v6, %v11_v2  ;;  %v20_v8 = vadd.s32 %v18_v6, %v12_v3  ;;  %v21_v9 = vadd.s32 %v18_v6, %v13_v4  ;;  %v22_v10 = vadd.s32 %v18_v6, %v14_v5  ;;  %s1181_s29 = scalar_lea.vmem %s1082_s28, 1024 }
   0x7   :  { %s29_s19 = sxor.u32 %s28_s18, %s27_s16  ;;  %s37_s20 = sshrl.u32 %s36_s17, 15 }
   0x8   :  { %s30_s21 = smul.u32 2221713035, %s29_s19  ;;  %s38_s22 = sxor.u32 %s37_s20, %s36_s17 }
   0x9   :  { %s39_s23 = smul.u32 2221713035, %s38_s22  ;;  %p1182_p0 = scmp.ne.s32.totalorder %s1082_s28, %s1181_s29 }
   0xa   :  { %s31_s24 = sshrl.u32 %s30_s21, 16  ;;  %p1186_p1 = scmp.lt.s32.totalorder %s1082_s28, %s1082_s28 }
   0xb   :  { %s32_s0 = sxor.u32 %s31_s24, %s30_s21  ;;  %s40_s25 = sshrl.u32 %s39_s23, 16 }
   0xc   :  { %s41_s26 = sxor.u32 %s40_s25, %s39_s23  ;;  %v42_v11 = vstv %s32_s0  ;;  %p1187_p2 = scmp.lt.s32.totalorder %s1181_s29, %s1181_s29 }
   0xd   :  { %v43_v12 = vadd.s32 %v42_v11, %v19_v7  ;;  %v44_v13 = vadd.s32 %v42_v11, %v20_v8  ;;  %v45_v14 = vadd.s32 %v42_v11, %v21_v9  ;;  %v46_v15 = vadd.s32 %v42_v11, %v22_v10 }
   0xe   :  { %v115_v16 = vstv %s41_s26  ;;  %p1188_p3 = por %p1187_p2, %p1186_p1 }
   0xf   :  { %v47_v17 = vshrl.u32 %v43_v12, 16  ;;  %v48_v18 = vshrl.u32 %v44_v13, 16  ;;  %v49_v19 = vshrl.u32 %v45_v14, 16  ;;  %v50_v20 = vshrl.u32 %v46_v15, 16 }
  0x10   :  { %v116_v21 = vadd.s32 %v115_v16, %v19_v7  ;;  %v117_v22 = vadd.s32 %v115_v16, %v20_v8  ;;  %v118_v23 = vadd.s32 %v115_v16, %v21_v9  ;;  %v119_v37 = vadd.s32 %v115_v16, %v22_v10  ;;  %p1189_p4 = pnand %p1188_p3, %p1182_p0 }
  0x11   :  { %v51_v24 = vxor.u32 %v47_v17, %v43_v12  ;;  %v52_v25 = vxor.u32 %v48_v18, %v44_v13  ;;  %v53_v26 = vxor.u32 %v49_v19, %v45_v14  ;;  %v54_v30 = vxor.u32 %v50_v20, %v46_v15 }
  0x12   :  { %v120_v27 = vshrl.u32 %v116_v21, 16  ;;  %v121_v28 = vshrl.u32 %v117_v22, 16  ;;  %v122_v29 = vshrl.u32 %v118_v23, 16  ;;  %v123_v49 = vshrl.u32 %v119_v37, 16 }
  0x13   :  { %v55_v31 = vmul.u32 2146121005, %v51_v24  ;;  %v56_v32 = vmul.u32 2146121005, %v52_v25 }
  0x14   :  { %v57_v33 = vmul.u32 2146121005, %v53_v26  ;;  %v124_v34 = vxor.u32 %v120_v27, %v116_v21  ;;  %v125_v35 = vxor.u32 %v121_v28, %v117_v22  ;;  %v126_v38 = vxor.u32 %v122_v29, %v118_v23 }
  0x15   :  { %v59_v36 = vshrl.u32 %v55_v31, 15  ;;  %v58_v41 = vmul.u32 2146121005, %v54_v30  ;;  %v60_v42 = vshrl.u32 %v56_v32, 15  ;;  %v127_v61 = vxor.u32 %v123_v49, %v119_v37 }
  0x16   :  { %v128_v39 = vmul.u32 2146121005, %v124_v34  ;;  %v129_v40 = vmul.u32 2146121005, %v125_v35  ;;  %v61_v45 = vshrl.u32 %v57_v33, 15 }
  0x17   :  { %v63_v43 = vxor.u32 %v59_v36, %v55_v31  ;;  %v130_v44 = vmul.u32 2146121005, %v126_v38  ;;  %v62_v53 = vshrl.u32 %v58_v41, 15  ;;  %v64_v54 = vxor.u32 %v60_v42, %v56_v32 }
  0x18   :  { %v132_v46 = vshrl.u32 %v128_v39, 15  ;;  %v133_v47 = vshrl.u32 %v129_v40, 15  ;;  %v65_v57 = vxor.u32 %v61_v45, %v57_v33  ;;  %v131_v6 = vmul.u32 2146121005, %v127_v61 }
  0x19   :  { %v67_v48 = vmul.u32 2221713035, %v63_v43  ;;  %v134_v50 = vshrl.u32 %v130_v44, 15  ;;  %v66_v1 = vxor.u32 %v62_v53, %v58_v41  ;;  %v68_v2 = vmul.u32 2221713035, %v64_v54 }
  0x1a   :  { %v136_v51 = vxor.u32 %v132_v46, %v128_v39  ;;  %v137_v52 = vxor.u32 %v133_v47, %v129_v40  ;;  %v69_v4 = vmul.u32 2221713035, %v65_v57  ;;  %v135_v15 = vshrl.u32 %v131_v6, 15 }
  0x1b   :  { %v71_v55 = vshrl.u32 %v67_v48, 16  ;;  %v138_v56 = vxor.u32 %v134_v50, %v130_v44  ;;  %v70_v11 = vmul.u32 2221713035, %v66_v1  ;;  %v72_v12 = vshrl.u32 %v68_v2, 16 }
  0x1c   :  { %v140_v58 = vmul.u32 2221713035, %v136_v51  ;;  %v141_v59 = vmul.u32 2221713035, %v137_v52  ;;  %v73_v14 = vshrl.u32 %v69_v4, 16  ;;  %v139_v27 = vxor.u32 %v135_v15, %v131_v6 }
  0x1d   :  { %v75_v60 = vxor.u32 %v71_v55, %v67_v48  ;;  %v142_v62 = vmul.u32 2221713035, %v138_v56  ;;  %v74_v21 = vshrl.u32 %v70_v11, 16  ;;  %v76_v22 = vxor.u32 %v72_v12, %v68_v2 }
  0x1e   :  { %v144_v63 = vshrl.u32 %v140_v58, 16  ;;  %v145_v0 = vshrl.u32 %v141_v59, 16  ;;  %v77_v23 = vxor.u32 %v73_v14, %v69_v4  ;;  %v143_v40 = vmul.u32 2221713035, %v139_v27 }
  0x1f   :  { %v79_v3 = vshrl.u32 %v75_v60, 8  ;;  %v146_v7 = vshrl.u32 %v142_v62, 16  ;;  %v78_v33 = vxor.u32 %v74_v21, %v70_v11  ;;  %v80_v36 = vshrl.u32 %v76_v22, 8 }
  0x20   :  { %v148_v9 = vxor.u32 %v144_v63, %v140_v58  ;;  %v149_v10 = vxor.u32 %v145_v0, %v141_v59  ;;  %v81_v37 = vshrl.u32 %v77_v23, 8  ;;  %v147_v51 = vshrl.u32 %v143_v40, 16 }
  0x21   :  { %v83_v5 = vshrl.u32 %v79_v3, 16  ;;  %v84_v8 = vand.u32 65535, %v79_v3  ;;  %v150_v16 = vxor.u32 %v146_v7, %v142_v62  ;;  %v82_v46 = vshrl.u32 %v78_v33, 8 }
  0x22   :  { %v152_v19 = vshrl.u32 %v148_v9, 8  ;;  %v153_v20 = vshrl.u32 %v149_v10, 8  ;;  %v89_v48 = vshrl.u32 %v80_v36, 16  ;;  %v95_v49 = vshrl.u32 %v81_v37, 16 }
  0x23   :  { %v85_v13 = vcvt.s32.f32 %v83_v5  ;;  %v87_v18 = vcvt.s32.f32 %v84_v8  ;;  %v154_v24 = vshrl.u32 %v150_v16, 8  ;;  %v90_v57 = vand.u32 65535, %v80_v36 }
  0x24   :  { %v156_v25 = vshrl.u32 %v152_v19, 16  ;;  %v157_v26 = vand.u32 65535, %v152_v19  ;;  %v162_v28 = vshrl.u32 %v153_v20, 16  ;;  %v163_v29 = vand.u32 65535, %v153_v20 }
  0x25   :  { %v86_v17 = vmul.f32 65536.0, %v85_v13  ;;  %v168_v39 = vshrl.u32 %v154_v24, 16  ;;  %v169_v44 = vand.u32 65535, %v154_v24  ;;  %v96_v58 = vand.u32 65535, %v81_v37 }
  0x26   :  { %v158_v31 = vcvt.s32.f32 %v156_v25  ;;  %v160_v32 = vcvt.s32.f32 %v157_v26  ;;  %v164_v34 = vcvt.s32.f32 %v162_v28  ;;  %v166_v35 = vcvt.s32.f32 %v163_v29 }
  0x27   :  { %v88_v30 = vadd.f32 %v87_v18, %v86_v17  ;;  %v170_v45 = vcvt.s32.f32 %v168_v39  ;;  %v172_v55 = vcvt.s32.f32 %v169_v44  ;;  %v101_v59 = vshrl.u32 %v82_v46, 16 }
  0x28   :  { %v159_v38 = vmul.f32 65536.0, %v158_v31  ;;  %v165_v41 = vmul.f32 65536.0, %v164_v34  ;;  %v91_v61 = vcvt.s32.f32 %v89_v48  ;;  %v97_v62 = vcvt.s32.f32 %v95_v49 }
  0x29   :  { %v107_v42 = vadd.f32 0.5, %v88_v30  ;;  %v171_v54 = vmul.f32 65536.0, %v170_v45  ;;  %v151_v0 = vxor.u32 %v147_v51, %v143_v40  ;;  %v93_v4 = vcvt.s32.f32 %v90_v57 }
  0x2a   :  { %v161_v43 = vadd.f32 %v160_v32, %v159_v38  ;;  %v167_v47 = vadd.f32 %v166_v35, %v165_v41  ;;  %v99_v5 = vcvt.s32.f32 %v96_v58  ;;  %v102_v6 = vand.u32 65535, %v82_v46 }
  0x2b   :  { %v111_v53 = vmul.f32 5.9604645e-08, %v107_v42  ;;  %v173_v2 = vadd.f32 %v172_v55, %v171_v54  ;;  %v103_v7 = vcvt.s32.f32 %v101_v59  ;;  %v92_v8 = vmul.f32 65536.0, %v91_v61 }
  0x2c   :  { %v180_v50 = vadd.f32 0.5, %v161_v43  ;;  %v181_v52 = vadd.f32 0.5, %v167_v47  ;;  %v98_v9 = vmul.f32 65536.0, %v97_v62  ;;  %v155_v12 = vshrl.u32 %v151_v0, 8 }
  0x2d   :  { %1149 = vlog2.f32 %v111_v53  ;;  %v182_v13 = vadd.f32 0.5, %v173_v2  ;;  %v104_v16 = vmul.f32 65536.0, %v103_v7  ;;  %v105_v17 = vcvt.s32.f32 %v102_v6 }
  0x2e   :  { %v184_v56 = vmul.f32 5.9604645e-08, %v180_v50  ;;  %v185_v60 = vmul.f32 5.9604645e-08, %v181_v52  ;;  %v94_v18 = vadd.f32 %v93_v4, %v92_v8  ;;  %v100_v19 = vadd.f32 %v99_v5, %v98_v9 }
  0x2f   :  { %v174_v22 = vshrl.u32 %v155_v12, 16  ;;  %v186_v23 = vmul.f32 5.9604645e-08, %v182_v13  ;;  %v106_v25 = vadd.f32 %v105_v17, %v104_v16  ;;  %v175_v29 = vand.u32 65535, %v155_v12 }
  0x30   :  { %v1228_v63 = vmul.f32 6.2831855, %v184_v56  ;;  %v1230_v1 = vmul.f32 6.2831855, %v185_v60  ;;  %v108_v26 = vadd.f32 0.5, %v94_v18  ;;  %v109_v27 = vadd.f32 0.5, %v100_v19 }
  0x31   :  { %v176_v30 = vcvt.s32.f32 %v174_v22  ;;  %v1237_v31 = vmul.f32 6.2831855, %v186_v23  ;;  %v1240_v36 = vadd.f32 0.5, %v106_v25  ;;  %v178_v41 = vcvt.s32.f32 %v175_v29 }
  0x32   :  { %v235_v3 = vand.u32 2139095040, %v1228_v63  ;;  %v338_v11 = vand.u32 2139095040, %v1230_v1  ;;  %v232_v20 = vand.u32 2147483647, %v1228_v63  ;;  %v335_v33 = vand.u32 2147483647, %v1230_v1 }
  0x33   :  { %v112_v37 = vmul.f32 5.9604645e-08, %v108_v26  ;;  %v113_v38 = vmul.f32 5.9604645e-08, %v109_v27  ;;  %v177_v40 = vmul.f32 65536.0, %v176_v30  ;;  %v441_v46 = vand.u32 2139095040, %v1237_v31 }
  0x34   :  { %v236_v10 = vshrl.u32 %v235_v3, 23  ;;  %v339_v15 = vshrl.u32 %v338_v11, 23  ;;  %v239_v28 = vand.u32 8388607, %v232_v20  ;;  %v1244_v45 = vand.u32 8388607, %v335_v33 }
  0x35   :  { %v1203_v48 = vmov 683565275   ;;  %v1204_v50 = vmov 2475754826   ;;  %v1205_v52 = vmov 2131351028   ;;  %1151 = vlog2.f32 %v112_v37 }
  0x36   :  { %v1092_v14 = vadd.s32 4294967169, %v236_v10  ;;  %v1096_v24 = vadd.s32 4294967169, %v339_v15  ;;  %v240_v39 = vor.u32 8388608, %v239_v28  ;;  %v1206_v54 = vmov 2102212464  }
  0x37   :  { %v1207_v56 = vmov 920167782   ;;  %v1208_v2 = vmov 1326507024   ;;  %v442_v11 = vshrl.u32 %v441_v46, 23  ;;  %v179_v15 = vadd.f32 %v178_v41, %v177_v40 }
  0x38   :  { %v242_v21 = vadd.s32 1, %v1092_v14  ;;  %v345_v34 = vadd.s32 1, %v1096_v24  ;;  %v1252_v58 = vshll.u32 %v240_v39, 8  ;;  %v343_v26 = vor.u32 8388608, %v1244_v45 }
  0x39   :  { %v1100_v30 = vadd.s32 4294967169, %v442_v11  ;;  %1153 = vlog2.f32 %v113_v38  ;;  %v183_v37 = vadd.f32 0.5, %v179_v15  ;;  %v438_v41 = vand.u32 2147483647, %v1237_v31 }
  0x3a   :  { %vm243_vm0 = vcmp.gt.s32.totalorder %v242_v21, 0  ;;  %v1150_v35 = vpop.eup %1149  ;;  %vm346_vm1 = vcmp.gt.s32.totalorder %v345_v34, 0  ;;  %v1286_v38 = vshll.u32 %v343_v26, 8  ;;  %vm234_vm14 = vcmp.lt.s32.totalorder %v1228_v63, 0 }
  0x3b   :  { %v244_v32 = vsel %vm243_vm0, %v242_v21, 0  ;;  %v189_v44 = vmul.f32 0.6931472, %v1150_v35  ;;  %v347_v59 = vsel %vm346_vm1, %v345_v34, 0 }
  0x3c   :  { %v245_v42 = vshrl.u32 %v244_v32, 5  ;;  %v246_v43 = vand.u32 31, %v244_v32  ;;  %v349_v4 = vand.u32 31, %v347_v59 }
  0x3d   :  { %v1280_v39 = vmul.f32 -2.0, %v189_v44 }
  0x3e   :  { %v247_v47 = vsub.s32 32, %v246_v43  ;;  %v249_v49 = vshll.u32 %v1203_v48, %v246_v43  ;;  %v252_v51 = vshll.u32 %v1204_v50, %v246_v43  ;;  %v255_v53 = vshll.u32 %v1205_v52, %v246_v43 }
  0x3f   :  { %v258_v55 = vshll.u32 %v1206_v54, %v246_v43  ;;  %v261_v57 = vshll.u32 %v1207_v56, %v246_v43  ;;  %vm264_vm2 = vcmp.lt.s32.totalorder %v245_v42, 1  ;;  %vm267_vm3 = vcmp.lt.s32.totalorder %v245_v42, 4 }
  0x40   :  { %v250_v60 = vshrl.u32 %v1204_v50, %v247_v47  ;;  %v253_v61 = vshrl.u32 %v1205_v52, %v247_v47  ;;  %v256_v62 = vshrl.u32 %v1206_v54, %v247_v47  ;;  %v259_v0 = vshrl.u32 %v1207_v56, %v247_v47 }
  0x41   :  { %v262_v3 = vshrl.u32 %v1208_v2, %v247_v47  ;;  %v248_v5 = vshrl.u32 %v1203_v48, %v247_v47  ;;  %vm266_vm4 = vcmp.lt.s32.totalorder %v245_v42, 3  ;;  %vm265_vm5 = vcmp.lt.s32.totalorder %v245_v42, 2 }
  0x42   :  { %v251_v6 = vor.u32 %v250_v60, %v249_v49  ;;  %v254_v7 = vor.u32 %v253_v61, %v252_v51  ;;  %v257_v8 = vor.u32 %v256_v62, %v255_v53  ;;  %v260_v9 = vor.u32 %v259_v0, %v258_v55  ;;  %v1152_v15 = vpop.eup %1151 }
  0x43   :  { %v263_v10 = vor.u32 %v262_v3, %v261_v57  ;;  %v350_v18 = vsub.s32 32, %v349_v4  ;;  %v352_v29 = vshll.u32 %v1203_v48, %v349_v4  ;;  %v348_v43 = vshrl.u32 %v347_v59, 5 }
  0x44   :  { %v269_v12 = vsel %vm267_vm3, %v257_v8, 2102212464  ;;  %v272_v13 = vsel %vm264_vm2, %v251_v6, %v254_v7  ;;  %v276_v14 = vsel %vm264_vm2, %v254_v7, %v257_v8  ;;  %v273_v16 = vsel %vm267_vm3, %v260_v9, 920167782 }
  0x45   :  { %v277_v17 = vsel %vm267_vm3, %v263_v10, 1326507024  ;;  %v268_v19 = vsel %vm264_vm2, %v248_v5, %v251_v6  ;;  %v270_v21 = vsel %vm266_vm4, %v254_v7, %v269_v12  ;;  %v274_v22 = vsel %vm266_vm4, %v257_v8, %v273_v16 }
  0x46   :  { %v278_v23 = vsel %vm266_vm4, %v260_v9, %v277_v17  ;;  %v275_v24 = vsel %vm265_vm5, %v272_v13, %v274_v22  ;;  %v271_v32 = vsel %vm265_vm5, %v268_v19, %v270_v21  ;;  %v353_v40 = vshrl.u32 %v1204_v50, %v350_v18 }
  0x47   :  { %v279_v25 = vsel %vm265_vm5, %v276_v14, %v278_v23  ;;  %v1276_v34 = vmul.u32.u64.low %v1252_v58, %v275_v24  ;;  %v1277_v35 = vmul.u32.u64.high %v1252_v58, %v275_v24, %v1276_v34  ;;  %v355_v45 = vshll.u32 %v1204_v50, %v349_v4 }
  0x48   :  { %v1270_v27 = vmul.u32.u64.low %v1252_v58, %v279_v25  ;;  %v1271_v28 = vmul.u32.u64.high %v1252_v58, %v279_v25, %v1270_v27  ;;  %v356_v46 = vshrl.u32 %v1205_v52, %v350_v18  ;;  %v287_v42 = vmul.u32 %v1252_v58, %v271_v32  ;;  %v1154_v25 = vpop.eup %1153 }
  0x49   :  { %v354_v47 = vor.u32 %v353_v40, %v352_v29  ;;  %v448_v49 = vadd.s32 1, %v1100_v30  ;;  %v290_v44 = vadd.s32 1, %v1277_v35  ;;  %v358_v53 = vshll.u32 %v1205_v52, %v349_v4 }
  0x4a   :  { %vm289_vm6 = vc.u32 %v1271_v28, %v1276_v34  ;;  %v357_v51 = vor.u32 %v356_v46, %v355_v45  ;;  %v359_v55 = vshrl.u32 %v1206_v54, %v350_v18  ;;  %v361_v57 = vshll.u32 %v1206_v54, %v349_v4 }
  0x4b   :  { %v362_v59 = vshrl.u32 %v1207_v56, %v350_v18  ;;  %v364_v60 = vshll.u32 %v1207_v56, %v349_v4  ;;  %v365_v58 = vshrl.u32 %v1208_v2, %v350_v18  ;;  %v291_v61 = vsel %vm289_vm6, %v290_v44, %v1277_v35 }
  0x4c   :  { %v351_v62 = vshrl.u32 %v1203_v48, %v350_v18  ;;  %v360_v0 = vor.u32 %v359_v55, %v358_v53  ;;  %vm367_vm7 = vcmp.lt.s32.totalorder %v348_v43, 1  ;;  %v292_v3 = vadd.s32 %v291_v61, %v287_v42 }
  0x4d   :  { %v363_v5 = vor.u32 %v362_v59, %v361_v57  ;;  %v366_v6 = vor.u32 %v365_v58, %v364_v60  ;;  %vm369_vm8 = vcmp.lt.s32.totalorder %v348_v43, 3  ;;  %vm368_vm9 = vcmp.lt.s32.totalorder %v348_v43, 2 }
  0x4e   :  { %vm370_vm10 = vcmp.lt.s32.totalorder %v348_v43, 4  ;;  %v375_v7 = vsel %vm367_vm7, %v354_v47, %v357_v51  ;;  %vm449_vm11 = vcmp.gt.s32.totalorder %v448_v49, 0  ;;  %v293_v8 = vadd.s32 536870912, %v292_v3 }
  0x4f   :  { %v372_v9 = vsel %vm370_vm10, %v360_v0, 2102212464  ;;  %v376_v10 = vsel %vm370_vm10, %v363_v5, 920167782  ;;  %v379_v4 = vsel %vm367_vm7, %v357_v51, %v360_v0  ;;  %v371_v11 = vsel %vm367_vm7, %v351_v62, %v354_v47 }
  0x50   :  { %v373_v12 = vsel %vm369_vm8, %v357_v51, %v372_v9  ;;  %v377_v13 = vsel %vm369_vm8, %v360_v0, %v376_v10  ;;  %v380_v14 = vsel %vm370_vm10, %v366_v6, 1326507024  ;;  %v1302_v16 = vshrl.u32 %v293_v8, 30 }
  0x51   :  { %v378_v17 = vsel %vm368_vm9, %v375_v7, %v377_v13  ;;  %v381_v18 = vsel %vm369_vm8, %v363_v5, %v380_v14  ;;  %v450_v19 = vsel %vm449_vm11, %v448_v49, 0  ;;  %v187_v21 = vmul.f32 5.9604645e-08, %v183_v37 }
  0x52   :  { %v382_v22 = vsel %vm368_vm9, %v379_v4, %v381_v18  ;;  %v1308_v23 = vmul.u32.u64.low %v1286_v38, %v378_v17  ;;  %v1309_v24 = vmul.u32.u64.high %v1286_v38, %v378_v17, %v1308_v23  ;;  %v295_v26 = vshll.u32 %v1302_v16, 30 }
  0x53   :  { %v374_v27 = vsel %vm368_vm9, %v371_v11, %v373_v12  ;;  %v1315_v29 = vmul.u32.u64.low %v1286_v38, %v382_v22  ;;  %v1316_v30 = vmul.u32.u64.high %v1286_v38, %v382_v22, %v1315_v29  ;;  %v1320_v32 = vand.u32 8388607, %v438_v41 }
  0x54   :  { %v452_v35 = vand.u32 31, %v450_v19  ;;  %v191_v37 = vmul.f32 0.6931472, %v1152_v15  ;;  %1155 = vrsqrt.f32 %v1280_v39  ;;  %v1323_v40 = vsub.s32 %v292_v3, %v295_v26 }
  0x55   :  { %v1325_v45 = vshrl.u32 %v450_v19, 5  ;;  %v390_v46 = vmul.u32 %v1286_v38, %v374_v27  ;;  %v393_v43 = vadd.s32 1, %v1309_v24  ;;  %v1331_v49 = vmul.f32 5.9604645e-08, %v1240_v36 }
  0x56   :  { %v453_v42 = vsub.s32 32, %v452_v35  ;;  %v455_v47 = vshll.u32 %v1203_v48, %v452_v35  ;;  %v1333_v44 = vmul.f32 6.2831855, %v187_v21  ;;  %v298_v51 = vsub.s32 0, %v1323_v40 }
  0x57   :  { %vm392_vm12 = vc.u32 %v1316_v30, %v1308_v23  ;;  %v1338_v53 = vmul.f32 0.6931472, %v1154_v25  ;;  %v458_v57 = vshll.u32 %v1204_v50, %v452_v35  ;;  %v1343_v59 = vmul.f32 -2.0, %v191_v37 }
  0x58   :  { %v394_v55 = vsel %vm392_vm12, %v393_v43, %v1309_v24  ;;  %v456_v38 = vshrl.u32 %v1204_v50, %v453_v42  ;;  %v1093_v36 = vmin.u32 %v298_v51, %v1323_v40  ;;  %v446_v60 = vor.u32 8388608, %v1320_v32 }
  0x59   :  { %vm473_vm13 = vcmp.lt.s32.totalorder %v1325_v45, 4  ;;  %v395_v58 = vadd.s32 %v394_v55, %v390_v46  ;;  %v459_v62 = vshrl.u32 %v1205_v52, %v453_v42  ;;  %v461_v0 = vshll.u32 %v1205_v52, %v452_v35 }
  0x5a   :  { %v457_v61 = vor.u32 %v456_v38, %v455_v47  ;;  %v300_v3 = vclz %v1093_v36  ;;  %v462_v5 = vshrl.u32 %v1206_v54, %v453_v42  ;;  %v464_v6 = vshll.u32 %v1206_v54, %v452_v35 }
  0x5b   :  { %v465_v7 = vshrl.u32 %v1207_v56, %v453_v42  ;;  %v396_v8 = vadd.s32 536870912, %v395_v58  ;;  %v460_v9 = vor.u32 %v459_v62, %v458_v57  ;;  %v467_v10 = vshll.u32 %v1207_v56, %v452_v35 }
  0x5c   :  { %v468_v4 = vshrl.u32 %v1208_v2, %v453_v42  ;;  %v288_v11 = vadd.s32 %v1276_v34, %v1271_v28  ;;  %v1094_v12 = vadd.s32 4294967294, %v300_v3  ;;  %vm470_vm15 = vcmp.lt.s32.totalorder %v1325_v45, 1 }
  0x5d   :  { %v466_v13 = vor.u32 %v465_v7, %v464_v6  ;;  %v318_v14 = vsub.s32 4, %v1302_v16  ;;  %v397_v15 = vshrl.u32 %v396_v8, 30  ;;  %v463_v17 = vor.u32 %v462_v5, %v461_v0 }
  0x5e   :  { %v469_v18 = vor.u32 %v468_v4, %v467_v10  ;;  %vm202_vm0 = vcmp.eq.f32.partialorder %v1280_v39, inf  ;;  %vm1095_vm1 = vcmp.lt.s32.totalorder %v1094_v12, 0  ;;  %vm471_vm2 = vcmp.lt.s32.totalorder %v1325_v45, 2 }
  0x5f   :  { %vm472_vm3 = vcmp.lt.s32.totalorder %v1325_v45, 3  ;;  %v479_v19 = vsel %vm473_vm13, %v466_v13, 920167782  ;;  %v303_v28 = vsel %vm1095_vm1, 0, %v1094_v12  ;;  %v398_v34 = vshll.u32 %v397_v15, 30 }
  0x60   :  { %v454_v21 = vshrl.u32 %v1203_v48, %v453_v42  ;;  %v478_v22 = vsel %vm470_vm15, %v457_v61, %v460_v9  ;;  %vm1370_vm4 = vcmp.le.f32.partialorder %v232_v20, 0.7853982  ;;  %v304_v25 = vsub.s32 32, %v303_v28 }
  0x61   :  { %v305_v26 = vshll.u32 %v1323_v40, %v303_v28  ;;  %v308_v27 = vsub.s32 4294967266, %v303_v28  ;;  %v475_v29 = vsel %vm473_vm13, %v463_v17, 2102212464  ;;  %v1156_v32 = vpop.eup %1155  ;;  %v1377_v35 = vsub.s32 %v395_v58, %v398_v34 }
  0x62   :  { %v480_v37 = vsel %vm472_vm3, %v463_v17, %v479_v19  ;;  %v482_v46 = vsel %vm470_vm15, %v460_v9, %v463_v17  ;;  %v483_v20 = vsel %vm473_vm13, %v469_v18, 1326507024  ;;  %1157 = vrsqrt.f32 %v1343_v59 }
  0x63   :  { %v306_v43 = vshrl.u32 %v288_v11, %v304_v25  ;;  %v309_v40 = vadd.s32 127, %v308_v27  ;;  %vm337_vm5 = vcmp.lt.s32.totalorder %v1230_v1, 0  ;;  %v486_v42 = vshll.u32 %v446_v60, 8 }
  0x64   :  { %v401_v47 = vsub.s32 0, %v1377_v35  ;;  %v474_v51 = vsel %vm470_vm15, %v454_v21, %v457_v61  ;;  %v476_v55 = vsel %vm472_vm3, %v460_v9, %v475_v29  ;;  %v484_v38 = vsel %vm472_vm3, %v466_v13, %v483_v20 }
  0x65   :  { %v307_v57 = vor.u32 %v306_v43, %v305_v26  ;;  %v310_v36 = vshll.u32 %v309_v40, 23  ;;  %v481_v58 = vsel %vm471_vm2, %v478_v22, %v480_v37  ;;  %v485_v62 = vsel %vm471_vm2, %v482_v46, %v484_v38 }
  0x66   :  { %v201_v60 = vmul.f32 %v1156_v32, %v1280_v39  ;;  %v319_v61 = vsel %vm234_vm14, %v318_v14, %v1302_v16  ;;  %vm1404_vm6 = vcmp.le.f32.partialorder %v335_v33, 0.7853982  ;;  %v1097_v3 = vmin.u32 %v401_v47, %v1377_v35 }
  0x67   :  { %v421_v5 = vsub.s32 4, %v397_v15  ;;  %v311_v6 = vor.u32 4788187, %v310_v36  ;;  %v314_v7 = vcvt.s32.f32 %v307_v57  ;;  %v477_v4 = vsel %vm471_vm2, %v474_v51, %v476_v55 }
  0x68   :  { %v1409_v8 = vmul.u32.u64.low %v486_v42, %v485_v62  ;;  %v1410_v9 = vmul.u32.u64.high %v486_v42, %v485_v62, %v1409_v8  ;;  %v403_v10 = vclz %v1097_v3  ;;  %vm204_vm7 = vcmp.eq.f32.partialorder %v1280_v39, 0.0 }
  0x69   :  { %v1414_v11 = vmul.u32.u64.low %v486_v42, %v481_v58  ;;  %v1415_v16 = vmul.u32.u64.high %v486_v42, %v481_v58, %v1414_v11  ;;  %v205_v33 = vand.u32 2147483648, %v1280_v39  ;;  %v312_v12 = vand.u32 2147483647, %v311_v6 }
  0x6a   :  { %v544_v13 = vand.u32 2139095040, %v1333_v44  ;;  %v203_v14 = vsel %vm202_vm0, %v1280_v39, %v201_v60  ;;  %v321_v17 = vsel %vm1370_vm4, 0, %v319_v61  ;;  %v391_v45 = vadd.s32 %v1308_v23, %v1316_v30 }
  0x6b   :  { %v1098_v18 = vadd.s32 4294967294, %v403_v10  ;;  %v315_v19 = vmul.f32 %v314_v7, %v312_v12  ;;  %v493_v28 = vmul.u32 %v486_v42, %v477_v4  ;;  %vm495_vm8 = vc.u32 %v1410_v9, %v1414_v11 }
  0x6c   :  { %v545_v34 = vshrl.u32 %v544_v13, 23  ;;  %v422_v21 = vsel %vm337_vm5, %v421_v5, %v397_v15  ;;  %v496_v22 = vadd.s32 1, %v1415_v16  ;;  %v541_v25 = vand.u32 2147483647, %v1333_v44 }
  0x6d   :  { %vm1099_vm9 = vcmp.lt.s32.totalorder %v1098_v18, 0  ;;  %v316_v26 = vxor.u32 2147483648, %v315_v19  ;;  %v1434_v27 = vand.u32 3, %v321_v17  ;;  %v424_v15 = vsel %vm1404_vm6, 0, %v422_v21 }
  0x6e   :  { %v406_v29 = vsel %vm1099_vm9, 0, %v1098_v18  ;;  %v1104_v23 = vadd.s32 4294967169, %v545_v34  ;;  %v497_v46 = vsel %vm495_vm8, %v496_v22, %v1415_v16  ;;  %v741_v57 = vadd.s32 3, %v321_v17 }
  0x6f   :  { %v407_v30 = vsub.s32 32, %v406_v29  ;;  %v408_v32 = vshll.u32 %v1377_v35, %v406_v29  ;;  %v411_v37 = vsub.s32 4294967266, %v406_v29  ;;  %v317_v20 = vsel %vm234_vm14, %v316_v26, %v315_v19  ;;  %v1158_v42 = vpop.eup %1157 }
  0x70   :  { %v498_v43 = vadd.s32 %v497_v46, %v493_v28  ;;  %v551_v40 = vadd.s32 1, %v1104_v23  ;;  %v320_v47 = vsel %vm1370_vm4, %v1228_v63, %v317_v20  ;;  %v548_v35 = vand.u32 8388607, %v541_v25 }
  0x71   :  { %v409_v51 = vshrl.u32 %v391_v45, %v407_v30  ;;  %v412_v55 = vadd.s32 127, %v411_v37  ;;  %1159 = vcosq.f32 %v320_v47  ;;  %v1448_v60 = vmul.f32 -2.0, %v1338_v53 }
  0x72   :  { %v499_v38 = vadd.s32 536870912, %v498_v43  ;;  %vm552_vm10 = vcmp.gt.s32.totalorder %v551_v40, 0  ;;  %1161 = vsinq.f32 %v320_v47  ;;  %v1451_v61 = vmul.f32 %v1158_v42, %v1343_v59 }
  0x73   :  { %v410_v36 = vor.u32 %v409_v51, %v408_v32  ;;  %v413_v58 = vshll.u32 %v412_v55, 23  ;;  %v553_v62 = vsel %vm552_vm10, %v551_v40, 0  ;;  %v1457_v5 = vsel %vm204_vm7, %v205_v33, %v203_v14 }
  0x74   :  { %v1453_v24 = vshrl.u32 %v499_v38, 30  ;;  %v555_v3 = vand.u32 31, %v553_v62  ;;  %v1459_v8 = vand.u32 3, %v424_v15  ;;  %v549_v4 = vor.u32 8388608, %v548_v35 }
  0x75   :  { %v414_v6 = vor.u32 4788187, %v413_v58  ;;  %v417_v7 = vcvt.s32.f32 %v410_v36  ;;  %v845_v53 = vadd.s32 3, %v424_v15  ;;  %vm330_vm11 = vcmp.eq.s32.totalorder %v1434_v27, 2 }
  0x76   :  { %v501_v10 = vshll.u32 %v1453_v24, 30  ;;  %v556_v16 = vsub.s32 32, %v555_v3  ;;  %v1463_v13 = vshrl.u32 %v553_v62, 5  ;;  %v558_v17 = vshll.u32 %v1203_v48, %v555_v3 }
  0x77   :  { %v415_v12 = vand.u32 2147483647, %v414_v6  ;;  %v1466_v45 = vand.u32 3, %v741_v57  ;;  %vm327_vm12 = vcmp.eq.s32.totalorder %v1434_v27, 0  ;;  %v561_v14 = vshll.u32 %v1204_v50, %v555_v3 }
  0x78   :  { %v1469_v39 = vsub.s32 %v498_v43, %v501_v10  ;;  %v559_v33 = vshrl.u32 %v1204_v50, %v556_v16  ;;  %v564_v18 = vshll.u32 %v1205_v52, %v555_v3  ;;  %vm326_vm13 = vcmp.lt.s32.totalorder %v1434_v27, 2 }
  0x79   :  { %v418_v19 = vmul.f32 %v417_v7, %v415_v12  ;;  %v562_v28 = vshrl.u32 %v1205_v52, %v556_v16  ;;  %v565_v34 = vshrl.u32 %v1206_v54, %v556_v16  ;;  %v567_v21 = vshll.u32 %v1206_v54, %v555_v3 }
  0x7a   :  { %vm324_vm14 = vweird.f32 %v1228_v63  ;;  %v494_v22 = vadd.s32 %v1414_v11, %v1410_v9  ;;  %v504_v26 = vsub.s32 0, %v1469_v39  ;;  %v568_v50 = vshrl.u32 %v1207_v56, %v556_v16 }
  0x7b   :  { %v1483_v29 = vand.u32 3, %v845_v53  ;;  %v419_v23 = vxor.u32 2147483648, %v418_v19  ;;  %v557_v30 = vshrl.u32 %v1203_v48, %v556_v16  ;;  %v570_v52 = vshll.u32 %v1207_v56, %v555_v3 }
  0x7c   :  { %v1487_v32 = vshll.u32 %v549_v4, 8  ;;  %v1101_v54 = vmin.u32 %v504_v26, %v1469_v39  ;;  %v560_v37 = vor.u32 %v559_v33, %v558_v17  ;;  %v563_v46 = vor.u32 %v562_v28, %v561_v14 }
  0x7d   :  { %v566_v20 = vor.u32 %v565_v34, %v564_v18  ;;  %vm744_vm15 = vcmp.eq.s32.totalorder %v1466_v45, 0  ;;  %vm747_vm0 = vcmp.eq.s32.totalorder %v1466_v45, 2  ;;  %v420_v9 = vsel %vm337_vm5, %v419_v23, %v418_v19 }
  0x7e   :  { %v569_v11 = vor.u32 %v568_v50, %v567_v21  ;;  %v571_v15 = vshrl.u32 %v1208_v2, %v556_v16  ;;  %vm573_vm1 = vcmp.lt.s32.totalorder %v1463_v13, 1  ;;  %v423_v48 = vsel %vm1404_vm6, %v1230_v1, %v420_v9  ;;  %v1160_v43 = vpop.eup %1159 }
  0x7f   :  { %v506_v56 = vclz %v1101_v54  ;;  %vm574_vm2 = vcmp.lt.s32.totalorder %v1463_v13, 2  ;;  %vm575_vm3 = vcmp.lt.s32.totalorder %v1463_v13, 3  ;;  %1163 = vcosq.f32 %v423_v48  ;;  %v1162_v2 = vpop.eup %1161 }
  0x80   :  { %v572_v40 = vor.u32 %v571_v15, %v570_v52  ;;  %vm576_vm4 = vcmp.lt.s32.totalorder %v1463_v13, 4  ;;  %v577_v42 = vsel %vm573_vm1, %v557_v30, %v560_v37  ;;  %vm209_vm5 = vcmp.eq.f32.partialorder %v1343_v59, inf }
  0x81   :  { %v331_v47 = vxor.u32 2147483648, %v1160_v43  ;;  %1165 = vsinq.f32 %v423_v48  ;;  %v1102_v0 = vadd.s32 4294967294, %v506_v56  ;;  %v578_v51 = vsel %vm576_vm4, %v566_v20, 2102212464 }
  0x82   :  { %v328_v55 = vxor.u32 2147483648, %v1162_v2  ;;  %v579_v35 = vsel %vm575_vm3, %v563_v46, %v578_v51  ;;  %v581_v38 = vsel %vm573_vm1, %v560_v37, %v563_v46  ;;  %v582_v57 = vsel %vm576_vm4, %v569_v11, 920167782 }
  0x83   :  { %v332_v36 = vsel %vm330_vm11, %v331_v47, %v1162_v2  ;;  %vm1103_vm6 = vcmp.lt.s32.totalorder %v1102_v0, 0  ;;  %v580_v58 = vsel %vm574_vm2, %v577_v42, %v579_v35  ;;  %v583_v62 = vsel %vm575_vm3, %v566_v20, %v582_v57 }
  0x84   :  { %v329_v3 = vsel %vm327_vm12, %v1160_v43, %v328_v55  ;;  %v509_v6 = vsel %vm1103_vm6, 0, %v1102_v0  ;;  %v584_v7 = vsel %vm574_vm2, %v581_v38, %v583_v62  ;;  %v585_v10 = vsel %vm573_vm1, %v563_v46, %v566_v20 }
  0x85   :  { %vm211_vm7 = vcmp.eq.f32.partialorder %v1343_v59, 0.0  ;;  %v333_v4 = vsel %vm326_vm13, %v329_v3, %v332_v36  ;;  %v510_v16 = vsub.s32 32, %v509_v6  ;;  %v511_v53 = vshll.u32 %v1469_v39, %v509_v6 }
  0x86   :  { %v514_v12 = vsub.s32 4294967266, %v509_v6  ;;  %v334_v17 = vsel %vm324_vm14, nan, %v333_v4  ;;  %v586_v33 = vsel %vm576_vm4, %v572_v40, 1326507024  ;;  %vm743_vm8 = vcmp.lt.s32.totalorder %v1466_v45, 2 }
  0x87   :  { %v1534_v14 = vmul.u32.u64.low %v1487_v32, %v584_v7  ;;  %v1535_v18 = vmul.u32.u64.high %v1487_v32, %v584_v7, %v1534_v14  ;;  %v512_v19 = vshrl.u32 %v494_v22, %v510_v16  ;;  %v587_v27 = vsel %vm575_vm3, %v569_v11, %v586_v33 }
  0x88   :  { %v515_v28 = vadd.s32 127, %v514_v12  ;;  %vm427_vm9 = vweird.f32 %v1230_v1  ;;  %vm440_vm10 = vcmp.lt.s32.totalorder %v1237_v31, 0  ;;  %v588_v39 = vsel %vm574_vm2, %v585_v10, %v587_v27 }
  0x89   :  { %v644_v34 = vmul.f32 %v334_v17, %v1457_v5  ;;  %v746_v21 = vsel %vm744_vm15, %v1160_v43, %v328_v55  ;;  %v749_v22 = vsel %vm747_vm0, %v331_v47, %v1162_v2  ;;  %vm1551_vm11 = vcmp.le.f32.partialorder %v438_v41, 0.7853982 }
  0x8a   :  { %v513_v50 = vor.u32 %v512_v19, %v511_v53  ;;  %v516_v23 = vshll.u32 %v515_v28, 23  ;;  %v1556_v30 = vmul.u32.u64.low %v1487_v32, %v588_v39  ;;  %v1557_v13 = vmul.u32.u64.high %v1487_v32, %v588_v39, %v1556_v30 }
  0x8b   :  { %v212_v52 = vand.u32 2147483648, %v1343_v59  ;;  %1167 = vrsqrt.f32 %v1448_v60  ;;  %v599_v54 = vadd.s32 1, %v1535_v18  ;;  %v750_v45 = vsel %vm743_vm8, %v746_v21, %v749_v22  ;;  %1068 = vst [vmem:[#allocation4] sm:$0xff] %v644_v34 }
  0x8c   :  { %v517_v37 = vor.u32 4788187, %v516_v23  ;;  %v520_v46 = vcvt.s32.f32 %v513_v50  ;;  %v596_v41 = vmul.u32 %v1487_v32, %v580_v58  ;;  %v751_v20 = vsel %vm324_vm14, nan, %v750_v45  ;;  %v1164_v15 = vpop.eup %1163 }
  0x8d   :  { %v210_v9 = vsel %vm209_vm5, %v1343_v59, %v1451_v61  ;;  %vm429_vm12 = vcmp.lt.s32.totalorder %v1459_v8, 2  ;;  %vm433_vm13 = vcmp.eq.s32.totalorder %v1459_v8, 2  ;;  %v1064_v11 = vmul.f32 %v751_v20, %v1457_v5 }
  0x8e   :  { %v518_v48 = vand.u32 2147483647, %v517_v37  ;;  %v1573_v56 = vadd.s32 %v1534_v14, %v1557_v13  ;;  %vm598_vm15 = vc.u32 %v1557_v13, %v1534_v14  ;;  %vm851_vm14 = vcmp.eq.s32.totalorder %v1483_v29, 2  ;;  %v1166_v63 = vpop.eup %1165 }
  0x8f   :  { %vm430_vm0 = vcmp.eq.s32.totalorder %v1459_v8, 0  ;;  %v434_v32 = vxor.u32 2147483648, %v1164_v15  ;;  %v600_v61 = vsel %vm598_vm15, %v599_v54, %v1535_v18  ;;  %vm848_vm1 = vcmp.eq.s32.totalorder %v1483_v29, 0  ;;  %1072 = vst [vmem:[#allocation4 + $0x20] sm:$0xff] %v1064_v11 }
  0x90   :  { %v431_v43 = vxor.u32 2147483648, %v1166_v63  ;;  %v521_v5 = vmul.f32 %v520_v46, %v518_v48  ;;  %v601_v40 = vadd.s32 %v600_v61, %v596_v41  ;;  %vm847_vm2 = vcmp.lt.s32.totalorder %v1483_v29, 2 }
  0x91   :  { %v213_v42 = vsel %vm211_vm7, %v212_v52, %v210_v9  ;;  %v435_v2 = vsel %vm433_vm13, %v434_v32, %v1166_v63  ;;  %v524_v47 = vsub.s32 4, %v1453_v24  ;;  %v853_v0 = vsel %vm851_vm14, %v434_v32, %v1166_v63 }
  0x92   :  { %v432_v51 = vsel %vm430_vm0, %v1164_v15, %v431_v43  ;;  %v522_v55 = vxor.u32 2147483648, %v521_v5  ;;  %v602_v35 = vadd.s32 536870912, %v601_v40  ;;  %v850_v38 = vsel %vm848_vm1, %v1164_v15, %v431_v43 }
  0x93   :  { %1169 = vlog2.f32 %v1331_v49  ;;  %v436_v57 = vsel %vm429_vm12, %v432_v51, %v435_v2  ;;  %v854_v36 = vsel %vm847_vm2, %v850_v38, %v853_v0  ;;  %v525_v3 = vsel %vm440_vm10, %v524_v47, %v1453_v24 }
  0x94   :  { %v437_v59 = vsel %vm427_vm9, nan, %v436_v57  ;;  %v523_v29 = vsel %vm440_vm10, %v522_v55, %v521_v5  ;;  %v1593_v58 = vshrl.u32 %v602_v35, 30  ;;  %v855_v62 = vsel %vm427_vm9, nan, %v854_v36 }
  0x95   :  { %v526_v49 = vsel %vm1551_vm11, %v1237_v31, %v523_v29  ;;  %v645_v8 = vmul.f32 %v437_v59, %v213_v42  ;;  %v1065_v6 = vmul.f32 %v855_v62, %v213_v42  ;;  %v527_v1 = vsel %vm1551_vm11, 0, %v525_v3 }
  0x96   :  { %1171 = vcosq.f32 %v526_v49  ;;  %v604_v7 = vshll.u32 %v1593_v58, 30  ;;  %v949_v53 = vadd.s32 3, %v527_v1  ;;  %v531_v17 = vand.u32 3, %v527_v1 }
  0x97   :  { %1173 = vsinq.f32 %v526_v49  ;;  %1069 = vst [vmem:[#allocation4 + $0x8] sm:$0xff] %v645_v8  ;;  %1073 = vst [vmem:[#allocation4 + $0x28] sm:$0xff] %v1065_v6  ;;  %vm216_vm3 = vcmp.eq.f32.partialorder %v1448_v60, inf  ;;  %vm218_vm4 = vcmp.eq.f32.partialorder %v1448_v60, 0.0  ;;  %vm530_vm5 = vweird.f32 %v1237_v31 }
  0x98   :  { %v1168_v10 = vpop.eup %1167  ;;  %v605_v4 = vsub.s32 %v601_v40, %v604_v7  ;;  %v950_v14 = vand.u32 3, %v949_v53  ;;  %v219_v27 = vand.u32 2147483648, %v1448_v60  ;;  %vm533_vm6 = vcmp.eq.s32.totalorder %v531_v17, 0 }
  0x99   :  { %v215_v12 = vmul.f32 %v1168_v10, %v1448_v60  ;;  %vm536_vm8 = vcmp.eq.s32.totalorder %v531_v17, 2  ;;  %vm532_vm11 = vcmp.lt.s32.totalorder %v531_v17, 2  ;;  %vm543_vm13 = vcmp.lt.s32.totalorder %v1333_v44, 0 }
  0x9a   :  { %v607_v16 = vsub.s32 0, %v605_v4  ;;  %vm952_vm9 = vcmp.eq.s32.totalorder %v950_v14, 0  ;;  %vm955_vm10 = vcmp.eq.s32.totalorder %v950_v14, 2  ;;  %vm951_vm12 = vcmp.lt.s32.totalorder %v950_v14, 2 }
  0x9b   :  { %v217_v28 = vsel %vm216_vm3, %v1448_v60, %v215_v12  ;;  %v627_v2 = vsub.s32 4, %v1593_v58  ;;  %vm542_vm15 = vcmp.le.f32.partialorder %v541_v25, 0.7853982 }
  0x9c   :  { %v1105_v24 = vmin.u32 %v607_v16, %v605_v4  ;;  %v220_v46 = vsel %vm218_vm4, %v219_v27, %v217_v28 }
  0x9d   :  { %v628_v31 = vsel %vm543_vm13, %v627_v2, %v1593_v58 }
  0x9e   :  { %v609_v33 = vclz %v1105_v24  ;;  %v630_v55 = vsel %vm542_vm15, 0, %v628_v31 }
  0x9f   :  { %v1053_v35 = vadd.s32 3, %v630_v55  ;;  %v634_v57 = vand.u32 3, %v630_v55 }
  0xa0   :  { %v1170_v18 = vpop.eup %1169  ;;  %v1106_v19 = vadd.s32 4294967294, %v609_v33 }
  0xa1   :  { %v195_v30 = vmul.f32 0.6931472, %v1170_v18  ;;  %v1054_v36 = vand.u32 3, %v1053_v35  ;;  %vm639_vm1 = vcmp.eq.s32.totalorder %v634_v57, 2  ;;  %vm636_vm3 = vcmp.eq.s32.totalorder %v634_v57, 0 }
  0xa2   :  { %vm1107_vm7 = vcmp.lt.s32.totalorder %v1106_v19, 0 }
  0xa3   :  { %v1172_v39 = vpop.eup %1171  ;;  %v612_v34 = vsel %vm1107_vm7, 0, %v1106_v19  ;;  %v199_v63 = vmul.f32 -2.0, %v195_v30  ;;  %vm1059_vm2 = vcmp.eq.s32.totalorder %v1054_v36, 2  ;;  %vm1056_vm4 = vcmp.eq.s32.totalorder %v1054_v36, 0 }
  0xa4   :  { %v1174_v21 = vpop.eup %1173  ;;  %v537_v22 = vxor.u32 2147483648, %v1172_v39  ;;  %v613_v26 = vsub.s32 32, %v612_v34  ;;  %v614_v50 = vshll.u32 %v605_v4, %v612_v34  ;;  %v617_v23 = vsub.s32 4294967266, %v612_v34 }
  0xa5   :  { %v534_v13 = vxor.u32 2147483648, %v1174_v21  ;;  %1175 = vrsqrt.f32 %v199_v63  ;;  %vm223_vm14 = vcmp.eq.f32.partialorder %v199_v63, inf  ;;  %vm225_vm0 = vcmp.eq.f32.partialorder %v199_v63, 0.0 }
  0xa6   :  { %v538_v52 = vsel %vm536_vm8, %v537_v22, %v1174_v21  ;;  %v615_v54 = vshrl.u32 %v1573_v56, %v613_v26  ;;  %v618_v45 = vadd.s32 127, %v617_v23  ;;  %v957_v37 = vsel %vm955_vm10, %v537_v22, %v1174_v21 }
  0xa7   :  { %v535_v41 = vsel %vm533_vm6, %v1172_v39, %v534_v13  ;;  %v954_v20 = vsel %vm952_vm9, %v1172_v39, %v534_v13  ;;  %v226_v62 = vand.u32 2147483648, %v199_v63  ;;  %vm1055_vm6 = vcmp.lt.s32.totalorder %v1054_v36, 2 }
  0xa8   :  { %v539_v9 = vsel %vm532_vm11, %v535_v41, %v538_v52  ;;  %v616_v11 = vor.u32 %v615_v54, %v614_v50  ;;  %v619_v15 = vshll.u32 %v618_v45, 23  ;;  %v958_v48 = vsel %vm951_vm12, %v954_v20, %v957_v37 }
  0xa9   :  { %v540_v32 = vsel %vm530_vm5, nan, %v539_v9  ;;  %v959_v56 = vsel %vm530_vm5, nan, %v958_v48  ;;  %vm635_vm5 = vcmp.lt.s32.totalorder %v634_v57, 2  ;;  %vm633_vm7 = vweird.f32 %v1333_v44 }
  0xaa   :  { %v620_v61 = vor.u32 4788187, %v619_v15  ;;  %v623_v43 = vcvt.s32.f32 %v616_v11  ;;  %v646_v5 = vmul.f32 %v540_v32, %v220_v46  ;;  %v1066_v60 = vmul.f32 %v959_v56, %v220_v46 }
  0xac   :  { %v621_v40 = vand.u32 2147483647, %v620_v61  ;;  %1070 = vst [vmem:[#allocation4 + $0x10] sm:$0xff] %v646_v5  ;;  %1074 = vst [vmem:[#allocation4 + $0x30] sm:$0xff] %v1066_v60 }
  0xae   :  { %v624_v42 = vmul.f32 %v623_v43, %v621_v40 }
  0xb0   :  { %v625_v47 = vxor.u32 2147483648, %v624_v42 }
  0xb2   :  { %v626_v0 = vsel %vm543_vm13, %v625_v47, %v624_v42  ;;  %v1176_v38 = vpop.eup %1175 }
  0xb3   :  { %v629_v51 = vsel %vm542_vm15, %v1333_v44, %v626_v0  ;;  %v222_v59 = vmul.f32 %v1176_v38, %v199_v63 }
  0xb4   :  { %1177 = vcosq.f32 %v629_v51 }
  0xb5   :  { %1179 = vsinq.f32 %v629_v51  ;;  %v224_v3 = vsel %vm223_vm14, %v199_v63, %v222_v59 }
  0xb6   :  { %v227_v7 = vsel %vm225_vm0, %v226_v62, %v224_v3 }
  0xc1   :  { %v1178_v29 = vpop.eup %1177 }
  0xc2   :  { %v1180_v25 = vpop.eup %1179  ;;  %v640_v58 = vxor.u32 2147483648, %v1178_v29 }
  0xc3   :  { %v637_v49 = vxor.u32 2147483648, %v1180_v25 }
  0xc4   :  { %v641_v8 = vsel %vm639_vm1, %v640_v58, %v1180_v25  ;;  %v1061_v6 = vsel %vm1059_vm2, %v640_v58, %v1180_v25 }
  0xc5   :  { %v638_v10 = vsel %vm636_vm3, %v1178_v29, %v637_v49  ;;  %v1058_v1 = vsel %vm1056_vm4, %v1178_v29, %v637_v49 }
  0xc6   :  { %v642_v4 = vsel %vm635_vm5, %v638_v10, %v641_v8  ;;  %v1062_v16 = vsel %vm1055_vm6, %v1058_v1, %v1061_v6 }
  0xc7   :  { %v643_v53 = vsel %vm633_vm7, nan, %v642_v4  ;;  %v1063_v24 = vsel %vm633_vm7, nan, %v1062_v16 }
  0xc8   :  { %v647_v12 = vmul.f32 %v643_v53, %v227_v7  ;;  %v1067_v17 = vmul.f32 %v1063_v24, %v227_v7 }
  0xca   :  { %1071 = vst [vmem:[#allocation4 + $0x18] sm:$0xff] %v647_v12  ;;  %1075 = vst [vmem:[#allocation4 + $0x38] sm:$0xff] %v1067_v17 }
  0xcb   :  { %1192 = shalt.err (!%p1189_p4)
}
  0xcc   :  { %s1210_s30 = smov 512   ;;  %s1211_s2 = smov 32  }
  0xcd   :  { %1087 = dma.vmem_to_hbm [thread:$0]  %s1082_s28, 1024, %s1633_s1, [#allocation5], %s1210_s30, %s1210_s30, %s1211_s2  }
  0xce   :  { %1201 = dma.done.wait [#allocation5], 1024  }
  0xcf   :  { %1202 = vsyncadd [#allocation5], 4294966272 }
  0xd0   :  { %1091 = vsyncpa [#allocation5], 1 }

</bundles_post_ra>
